<compile_context>
chip_gen: v5e
topology: v5e:2x2
jax: 0.10.0
libtpu: 0.0.40
codegen_flags: <defaults>
</compile_context>

<pallas_src>
import functools

import jax
import jax.numpy as jnp
from jax.experimental import pallas as pl
from jax.experimental.pallas import tpu as pltpu

EPS = 1e-5  # nn.BatchNorm2d default


def _round_up(x, m):
    return ((x + m - 1) // m) * m


def _vmem_limit_bytes():
    """Scoped VMEM limit: ~3/4 of physical VMEM, capped at 96 MiB.

    -> ~96 MiB on v5e/v6e (128 MiB physical), ~48 MiB on v7x (64 MiB physical).
    """
    cap = 128 * 1024 * 1024
    try:
        info = pltpu.get_tpu_info()
        cap = int(getattr(info, "vmem_capacity_bytes", cap))
    except Exception:
        pass
    return int(min(96 * 1024 * 1024, (cap * 3) // 4))


def _sublane_multiple(dtype):
    itemsize = jnp.dtype(dtype).itemsize
    if itemsize >= 4:
        return 8
    if itemsize == 2:
        return 16
    return 32


def _pick_c_block(c, dtype, max_c):
    """Largest divisor of C that is a dtype-aware sublane multiple (<= max_c), else full C."""
    m = _sublane_multiple(dtype)
    if c % m != 0:
        return c  # full-C block (allowed: equals the full array dim)
    best = m
    for cand in range(m, min(c, max_c) + 1, m):
        if c % cand == 0:
            best = cand
    return best


def _pick_hw_block(hw_padded, c_blk, itemsize, budget_bytes, n_streams, max_hw):
    """Largest multiple of 128 dividing hw_padded such that n_streams double-buffered
    (1, c_blk, hw_blk) blocks fit inside budget_bytes (and hw_blk <= max_hw)."""
    max_by_budget = budget_bytes // (2 * n_streams * c_blk * itemsize)
    max_by_budget = (max_by_budget // 128) * 128
    limit = min(hw_padded, max_hw, max(128, max_by_budget))
    best = 128
    blk = 128
    while blk <= limit:
        if hw_padded % blk == 0:
            best = blk
        blk += 128
    return best


def _stats_kernel(x_ref, gamma_ref, beta_ref, scale_ref, shift_ref,
                  sum_acc, sq_acc, *, inv_m, eps):
    """Accumulate per-channel sum / sumsq into lane-dense VMEM scratch (VALU only);
    finalize to scale = gamma*rstd, shift = beta - mean*scale on the last step."""
    ni = pl.program_id(1)
    hi = pl.program_id(2)
    is_first = jnp.logical_and(ni == 0, hi == 0)
    is_last = jnp.logical_and(
        ni == pl.num_programs(1) - 1, hi == pl.num_programs(2) - 1
    )

    @pl.when(is_first)
    def _():
        sum_acc[...] = jnp.zeros_like(sum_acc)
        sq_acc[...] = jnp.zeros_like(sq_acc)

    hw_blk = x_ref.shape[2]
    acc_s = sum_acc[...]                     # (1, c_blk, 128)
    acc_q = sq_acc[...]
    # Stream lane-aligned 128-wide columns straight from the ref; pure VALU adds,
    # no cross-lane reduction per step.
    for j in range(hw_blk // 128):
        col = x_ref[:, :, j * 128:(j + 1) * 128].astype(jnp.float32)  # (1, c_blk, 128)
        acc_s = acc_s + col
        acc_q = acc_q + col * col
    sum_acc[...] = acc_s
    sq_acc[...] = acc_q

    @pl.when(is_last)
    def _():
        # Single 128-lane XLU reduce per channel tile.
        s = jnp.sum(sum_acc[...], axis=-1, keepdims=True)    # (1, c_blk, 1)
        ss = jnp.sum(sq_acc[...], axis=-1, keepdims=True)
        mean = s * inv_m
        var = jnp.maximum(ss * inv_m - mean * mean, 0.0)      # biased var (training BN)
        rstd = jax.lax.rsqrt(var + eps)
        scale = gamma_ref[...] * rstd
        scale_ref[...] = scale
        shift_ref[...] = beta_ref[...] - mean * scale


def _norm_kernel(x_ref, scale_ref, shift_ref, o_ref):
    """y = x * scale + shift with per-channel scale/shift broadcast over lanes."""
    x = x_ref[...].astype(jnp.float32)             # (1, c_blk, hw_blk)
    y = x * scale_ref[...] + shift_ref[...]        # (1, c_blk, 1) broadcasts
    o_ref[...] = y.astype(o_ref.dtype)


def bn_hessian_forward(x_nchw, gamma, beta, eps=EPS):
    """BN_hessian.forward: BatchNorm2d in training mode (batch statistics)."""
    n, c, h, w = x_nchw.shape
    hw = h * w
    x3 = x_nchw.reshape(n, c, hw)                  # free reshape, no transpose

    # Pad HW to a multiple of 128 so all stores are unmasked lane-dense vst.
    hw_pad = _round_up(hw, 128)
    if hw_pad != hw:
        x3 = jnp.pad(x3, ((0, 0), (0, 0), (0, hw_pad - hw)))

    itemsize = x3.dtype.itemsize
    vmem_limit = _vmem_limit_bytes()
    block_budget = vmem_limit // 2                 # double-buffered traffic <= half limit

    # Separate block plans: pass 1 double-buffers only x; pass 2 double-buffers x and y.
    c_blk1 = _pick_c_block(c, x3.dtype, max_c=64)
    c_blk2 = _pick_c_block(c, x3.dtype, max_c=128)
    hw_blk1 = _pick_hw_block(hw_pad, c_blk1, itemsize, block_budget,
                             n_streams=1, max_hw=16384)
    hw_blk2 = _pick_hw_block(hw_pad, c_blk2, itemsize, block_budget,
                             n_streams=2, max_hw=8192)
    c_tiles1 = c // c_blk1
    c_tiles2 = c // c_blk2
    hw_tiles1 = hw_pad // hw_blk1
    hw_tiles2 = hw_pad // hw_blk2

    inv_m = 1.0 / float(n * hw)                    # true element count (pad is zeros)

    # gamma/beta (==1/0 after weight_init) are folded inside the stats finalize.
    g = gamma.reshape(1, c, 1).astype(jnp.float32)
    b = beta.reshape(1, c, 1).astype(jnp.float32)

    stats_shape = jax.ShapeDtypeStruct((1, c, 1), jnp.float32)
    stats_spec1 = pl.BlockSpec((1, c_blk1, 1), lambda ci, ni, hi: (0, ci, 0))
    stats_spec2 = pl.BlockSpec((1, c_blk2, 1), lambda ci, ni, hi: (0, ci, 0))
    x_spec1 = pl.BlockSpec((1, c_blk1, hw_blk1), lambda ci, ni, hi: (ni, ci, hi))
    x_spec2 = pl.BlockSpec((1, c_blk2, hw_blk2), lambda ci, ni, hi: (ni, ci, hi))

    # Pass 1: per-channel scale = gamma * rsqrt(var + eps), shift = beta - mean * scale.
    scale, shift = pl.pallas_call(
        functools.partial(_stats_kernel, inv_m=inv_m, eps=eps),
        out_shape=(stats_shape, stats_shape),
        grid_spec=pltpu.PrefetchScalarGridSpec(
            num_scalar_prefetch=0,
            grid=(c_tiles1, n, hw_tiles1),
            in_specs=[x_spec1, stats_spec1, stats_spec1],
            out_specs=(stats_spec1, stats_spec1),
            scratch_shapes=[
                pltpu.VMEM((1, c_blk1, 128), jnp.float32),
                pltpu.VMEM((1, c_blk1, 128), jnp.float32),
            ],
        ),
        compiler_params=pltpu.CompilerParams(
            dimension_semantics=("parallel", "arbitrary", "arbitrary"),
            vmem_limit_bytes=vmem_limit,
        ),
    )(x3, g, b)

    # Pass 2: elementwise normalize, fully pipelined; every grid axis is independent.
    y3 = pl.pallas_call(
        _norm_kernel,
        out_shape=jax.ShapeDtypeStruct((n, c, hw_pad), x_nchw.dtype),
        grid_spec=pltpu.PrefetchScalarGridSpec(
            num_scalar_prefetch=0,
            grid=(c_tiles2, n, hw_tiles2),
            in_specs=[x_spec2, stats_spec2, stats_spec2],
            out_specs=x_spec2,
        ),
        compiler_params=pltpu.CompilerParams(
            dimension_semantics=("parallel", "parallel", "parallel"),
            vmem_limit_bytes=vmem_limit,
        ),
    )(x3, scale, shift)

    if hw_pad != hw:
        y3 = y3[:, :, :hw]
    return y3.reshape(n, c, h, w)


def bn_reference(x_nchw, gamma, beta):
    mean = jnp.mean(x_nchw, axis=(0, 2, 3), keepdims=True)
    var = jnp.mean((x_nchw - mean) ** 2, axis=(0, 2, 3), keepdims=True)
    g = gamma.reshape(1, -1, 1, 1)
    b = beta.reshape(1, -1, 1, 1)
    return (x_nchw - mean) * jax.lax.rsqrt(var + EPS) * g + b


if __name__ == "__main__":
    planes = 4
    key = jax.random.PRNGKey(0)
    x = jax.random.normal(key, (2, planes, 16, 16), dtype=jnp.float32)

    # BN_hessian.weight_init(): BatchNorm2d weight=1, bias=0 (deterministic)
    gamma = jnp.ones((planes,), dtype=jnp.float32)
    beta = jnp.zeros((planes,), dtype=jnp.float32)

    y = bn_hessian_forward(x, gamma, beta)
    y = jax.block_until_ready(y)

    y_ref = bn_reference(x, gamma, beta)
    assert y.shape == x.shape
    assert jnp.allclose(y, y_ref, atol=1e-5, rtol=1e-5)

    print("KERNEL_OK")
</pallas_src>

<mosaic_0001>
module attributes {stable_mosaic.version = 11 : i64} {
  func.func @_stats_kernel(%arg0: i32, %arg1: i32, %arg2: i32, %arg3: memref<1x4x256xf32, #tpu.memory_space<vmem>>, %arg4: memref<1x4x1xf32, #tpu.memory_space<vmem>>, %arg5: memref<1x4x1xf32, #tpu.memory_space<vmem>>, %arg6: memref<1x4x1xf32, #tpu.memory_space<vmem>>, %arg7: memref<1x4x1xf32, #tpu.memory_space<vmem>>, %arg8: memref<1x4x128xf32, #tpu.memory_space<vmem>>, %arg9: memref<1x4x128xf32, #tpu.memory_space<vmem>>) attributes {dimension_semantics = [#tpu.dimension_semantics<parallel>, #tpu.dimension_semantics<arbitrary>, #tpu.dimension_semantics<arbitrary>], iteration_bounds = array<i64: 1, 2, 1>, scalar_prefetch = 0 : i64, scratch_operands = 2 : i64, tpu.core_type = #tpu.core_type<tc>, window_params = [{transform_indices = @transform_0, window_bounds = array<i64: 1, 4, 256>}, {transform_indices = @transform_1, window_bounds = array<i64: 1, 4, 1>}, {transform_indices = @transform_2, window_bounds = array<i64: 1, 4, 1>}, {transform_indices = @transform_3, window_bounds = array<i64: 1, 4, 1>}, {transform_indices = @transform_4, window_bounds = array<i64: 1, 4, 1>}]} {
    %c0_i32 = arith.constant 0 : i32
    %0 = arith.cmpi eq, %arg1, %c0_i32 : i32
    %c0_i32_0 = arith.constant 0 : i32
    %1 = arith.cmpi eq, %arg2, %c0_i32_0 : i32
    %2 = arith.andi %0, %1 : i1
    %c1_i32 = arith.constant 1 : i32
    %3 = arith.cmpi eq, %arg1, %c1_i32 : i32
    %c0_i32_1 = arith.constant 0 : i32
    %4 = arith.cmpi eq, %arg2, %c0_i32_1 : i32
    %5 = arith.andi %3, %4 : i1
    %6 = arith.extui %2 : i1 to i32
    %c0_i32_2 = arith.constant 0 : i32
    %7 = arith.cmpi ne, %6, %c0_i32_2 : i32
    scf.if %7 {
      %cst = arith.constant 0.000000e+00 : f32
      %22 = vector.broadcast %cst : f32 to vector<1x4x128xf32>
      %c0_20 = arith.constant 0 : index
      %c0_21 = arith.constant 0 : index
      %c0_22 = arith.constant 0 : index
      %23 = vector.load %arg8[%c0_20, %c0_21, %c0_22] : memref<1x4x128xf32, #tpu.memory_space<vmem>>, vector<1x4x128xf32>
      tpu.vector_store %arg8[%c0_20, %c0_21, %c0_22], %22 {strides = array<i32>} : memref<1x4x128xf32, #tpu.memory_space<vmem>>, vector<1x4x128xf32>,
      %cst_23 = arith.constant 0.000000e+00 : f32
      %24 = vector.broadcast %cst_23 : f32 to vector<1x4x128xf32>
      %c0_24 = arith.constant 0 : index
      %c0_25 = arith.constant 0 : index
      %c0_26 = arith.constant 0 : index
      %25 = vector.load %arg9[%c0_24, %c0_25, %c0_26] : memref<1x4x128xf32, #tpu.memory_space<vmem>>, vector<1x4x128xf32>
      tpu.vector_store %arg9[%c0_24, %c0_25, %c0_26], %24 {strides = array<i32>} : memref<1x4x128xf32, #tpu.memory_space<vmem>>, vector<1x4x128xf32>,
    } else {
    }
    %c0 = arith.constant 0 : index
    %c0_3 = arith.constant 0 : index
    %c0_4 = arith.constant 0 : index
    %8 = vector.load %arg8[%c0, %c0_3, %c0_4] : memref<1x4x128xf32, #tpu.memory_space<vmem>>, vector<1x4x128xf32>
    %c0_5 = arith.constant 0 : index
    %c0_6 = arith.constant 0 : index
    %c0_7 = arith.constant 0 : index
    %9 = vector.load %arg9[%c0_5, %c0_6, %c0_7] : memref<1x4x128xf32, #tpu.memory_space<vmem>>, vector<1x4x128xf32>
    %c0_8 = arith.constant 0 : index
    %c0_9 = arith.constant 0 : index
    %c0_10 = arith.constant 0 : index
    %10 = vector.load %arg3[%c0_8, %c0_9, %c0_10] : memref<1x4x256xf32, #tpu.memory_space<vmem>>, vector<1x4x128xf32>
    %11 = arith.addf %8, %10 : vector<1x4x128xf32>
    %12 = arith.mulf %10, %10 : vector<1x4x128xf32>
    %13 = arith.addf %9, %12 : vector<1x4x128xf32>
    %c0_11 = arith.constant 0 : index
    %c0_12 = arith.constant 0 : index
    %c128 = arith.constant 128 : index
    %14 = vector.load %arg3[%c0_11, %c0_12, %c128] : memref<1x4x256xf32, #tpu.memory_space<vmem>>, vector<1x4x128xf32>
    %15 = arith.addf %11, %14 : vector<1x4x128xf32>
    %16 = arith.mulf %14, %14 : vector<1x4x128xf32>
    %17 = arith.addf %13, %16 : vector<1x4x128xf32>
    %c0_13 = arith.constant 0 : index
    %c0_14 = arith.constant 0 : index
    %c0_15 = arith.constant 0 : index
    %18 = vector.load %arg8[%c0_13, %c0_14, %c0_15] : memref<1x4x128xf32, #tpu.memory_space<vmem>>, vector<1x4x128xf32>
    tpu.vector_store %arg8[%c0_13, %c0_14, %c0_15], %15 {strides = array<i32>} : memref<1x4x128xf32, #tpu.memory_space<vmem>>, vector<1x4x128xf32>,
    %c0_16 = arith.constant 0 : index
    %c0_17 = arith.constant 0 : index
    %c0_18 = arith.constant 0 : index
    %19 = vector.load %arg9[%c0_16, %c0_17, %c0_18] : memref<1x4x128xf32, #tpu.memory_space<vmem>>, vector<1x4x128xf32>
    tpu.vector_store %arg9[%c0_16, %c0_17, %c0_18], %17 {strides = array<i32>} : memref<1x4x128xf32, #tpu.memory_space<vmem>>, vector<1x4x128xf32>,
    %20 = arith.extui %5 : i1 to i32
    %c0_i32_19 = arith.constant 0 : i32
    %21 = arith.cmpi ne, %20, %c0_i32_19 : i32
    scf.if %21 {
      %c0_20 = arith.constant 0 : index
      %c0_21 = arith.constant 0 : index
      %c0_22 = arith.constant 0 : index
      %22 = vector.load %arg8[%c0_20, %c0_21, %c0_22] : memref<1x4x128xf32, #tpu.memory_space<vmem>>, vector<1x4x128xf32>
      %cst = arith.constant dense<0.000000e+00> : vector<1x4xf32>
      %23 = vector.multi_reduction <add>, %22, %cst [2] : vector<1x4x128xf32> to vector<1x4xf32>
      %24 = vector.shape_cast %23 : vector<1x4xf32> to vector<1x4x1xf32>
      %c0_23 = arith.constant 0 : index
      %c0_24 = arith.constant 0 : index
      %c0_25 = arith.constant 0 : index
      %25 = vector.load %arg9[%c0_23, %c0_24, %c0_25] : memref<1x4x128xf32, #tpu.memory_space<vmem>>, vector<1x4x128xf32>
      %cst_26 = arith.constant dense<0.000000e+00> : vector<1x4xf32>
      %26 = vector.multi_reduction <add>, %25, %cst_26 [2] : vector<1x4x128xf32> to vector<1x4xf32>
      %27 = vector.shape_cast %26 : vector<1x4xf32> to vector<1x4x1xf32>
      %cst_27 = arith.constant 0.001953125 : f32
      %28 = vector.broadcast %cst_27 : f32 to vector<1x4x1xf32>
      %29 = arith.mulf %24, %28 : vector<1x4x1xf32>
      %cst_28 = arith.constant 0.001953125 : f32
      %30 = vector.broadcast %cst_28 : f32 to vector<1x4x1xf32>
      %31 = arith.mulf %27, %30 : vector<1x4x1xf32>
      %32 = arith.mulf %29, %29 : vector<1x4x1xf32>
      %33 = arith.subf %31, %32 : vector<1x4x1xf32>
      %cst_29 = arith.constant 0.000000e+00 : f32
      %34 = vector.broadcast %cst_29 : f32 to vector<1x4x1xf32>
      %35 = arith.maximumf %33, %34 : vector<1x4x1xf32>
      %cst_30 = arith.constant 9.99999974E-6 : f32
      %36 = vector.broadcast %cst_30 : f32 to vector<1x4x1xf32>
      %37 = arith.addf %35, %36 : vector<1x4x1xf32>
      %38 = math.rsqrt %37 : vector<1x4x1xf32>
      %c0_31 = arith.constant 0 : index
      %c0_32 = arith.constant 0 : index
      %c0_33 = arith.constant 0 : index
      %39 = vector.load %arg4[%c0_31, %c0_32, %c0_33] : memref<1x4x1xf32, #tpu.memory_space<vmem>>, vector<1x4x1xf32>
      %40 = arith.mulf %39, %38 : vector<1x4x1xf32>
      %c0_34 = arith.constant 0 : index
      %c0_35 = arith.constant 0 : index
      %c0_36 = arith.constant 0 : index
      %41 = vector.load %arg6[%c0_34, %c0_35, %c0_36] : memref<1x4x1xf32, #tpu.memory_space<vmem>>, vector<1x4x1xf32>
      tpu.vector_store %arg6[%c0_34, %c0_35, %c0_36], %40 {strides = array<i32>} : memref<1x4x1xf32, #tpu.memory_space<vmem>>, vector<1x4x1xf32>,
      %c0_37 = arith.constant 0 : index
      %c0_38 = arith.constant 0 : index
      %c0_39 = arith.constant 0 : index
      %42 = vector.load %arg5[%c0_37, %c0_38, %c0_39] : memref<1x4x1xf32, #tpu.memory_space<vmem>>, vector<1x4x1xf32>
      %43 = arith.mulf %29, %40 : vector<1x4x1xf32>
      %44 = arith.subf %42, %43 : vector<1x4x1xf32>
      %c0_40 = arith.constant 0 : index
      %c0_41 = arith.constant 0 : index
      %c0_42 = arith.constant 0 : index
      %45 = vector.load %arg7[%c0_40, %c0_41, %c0_42] : memref<1x4x1xf32, #tpu.memory_space<vmem>>, vector<1x4x1xf32>
      tpu.vector_store %arg7[%c0_40, %c0_41, %c0_42], %44 {strides = array<i32>} : memref<1x4x1xf32, #tpu.memory_space<vmem>>, vector<1x4x1xf32>,
    } else {
    }
    return
  }
  func.func @transform_0(%arg0: i32, %arg1: i32, %arg2: i32) -> (i32, i32, i32) {
    %c0_i32 = arith.constant 0 : i32
    return %arg1, %arg0, %arg2 : i32, i32, i32
  }
  func.func @transform_1(%arg0: i32, %arg1: i32, %arg2: i32) -> (i32, i32, i32) {
    %c0_i32 = arith.constant 0 : i32
    %c0_i32_0 = arith.constant 0 : i32
    %c0_i32_1 = arith.constant 0 : i32
    return %c0_i32, %arg0, %c0_i32_0 : i32, i32, i32
  }
  func.func @transform_2(%arg0: i32, %arg1: i32, %arg2: i32) -> (i32, i32, i32) {
    %c0_i32 = arith.constant 0 : i32
    %c0_i32_0 = arith.constant 0 : i32
    %c0_i32_1 = arith.constant 0 : i32
    return %c0_i32, %arg0, %c0_i32_0 : i32, i32, i32
  }
  func.func @transform_3(%arg0: i32, %arg1: i32, %arg2: i32) -> (i32, i32, i32) {
    %c0_i32 = arith.constant 0 : i32
    %c0_i32_0 = arith.constant 0 : i32
    %c0_i32_1 = arith.constant 0 : i32
    return %c0_i32, %arg0, %c0_i32_0 : i32, i32, i32
  }
  func.func @transform_4(%arg0: i32, %arg1: i32, %arg2: i32) -> (i32, i32, i32) {
    %c0_i32 = arith.constant 0 : i32
    %c0_i32_0 = arith.constant 0 : i32
    %c0_i32_1 = arith.constant 0 : i32
    return %c0_i32, %arg0, %c0_i32_0 : i32, i32, i32
  }
}

</mosaic_0001>

<bundles_post_ra>
// kernel: tpu_custom_call.1
= control target key start
LH: loop header
LB: loop body
LE: loop exit
PB: predicated region body
PF: predicated region fallthrough
CT: control target
= control target key end

     0   :  { %10 = vsyncpa [#allocation5], 0  ;;  %s767_s0 = inlined_call_operand.hbm [shape: f32[2,4,256], index: 0, kind: input, shape index: {}]   ;;  %s768_s1 = inlined_call_operand.vmem [shape: f32[1,4,1], index: 1, kind: input, shape index: {}]   ;;  %s769_s2 = inlined_call_operand.vmem [shape: f32[1,4,1], index: 2, kind: input, shape index: {}]   ;;  %s770_s3 = inlined_call_operand.vmem [shape: f32[1,4,1], index: 3, kind: output, shape index: {0}]   ;;  %s771_s4 = inlined_call_operand.vmem [shape: f32[1,4,1], index: 4, kind: output, shape index: {1}]  }
   0x1   :  { %12 = vsyncpa [#allocation5 + $0x1], 0  ;;  %s668_s15 = smov 0   ;;  %s670_s16 = smov 0  }
   0x2   :  { %s672_s17 = smov 0   ;;  %s674_s18 = smov 0  }
   0x3   :  { %s676_s19 = smov 0   ;;  %s678_s20 = smov 0  }
   0x4 LB: > { %s483_s21 = sadd.s32 4294967295, %s640_s20   ;;  %s33_s22 = sadd.s32 1, %s636_s19  ;;  %s640_s20 = sphi %s678_s20, %s18_s20   ;;  %s636_s19 = sphi %s676_s19, %s778_s19   ;;  %s632_s18 = sphi %s674_s18, %s777_s18   ;;  %s628_s17 = sphi %s672_s17, %s776_s17   ;;  %s624_s16 = sphi %s670_s16, %s775_s16   ;;  %s620_s15 = sphi %s668_s15, %s774_s15  }
   0x5   : > { %p35_p0 = scmp.ge.s32.totalorder %s33_s22, 2  ;;  %s48_s23 = sadd.s32 1, %s628_s17 }
   0x6   : > { %p55_p1 = scmp.ne.s32.totalorder %s628_s17, %s624_s16  ;;  %p56_p2 = scmp.eq.s32.totalorder %s640_s20, 0 }
   0x7   : > { %s780_s22 = smov (%p35_p0, %s33_s22), 0  ;;  %p61_p4 = scmp.ne.s32.totalorder %s624_s16, %s620_s15 }
   0x8   : > { %p704_p3 = por %p56_p2, %p55_p1  ;;  %s41_s25 = ssub.s32 %s636_s19, %s780_s22 }
   0x9   : > { %p62_p5 = scmp.eq.s32.totalorder %s483_s21, 0  ;;  %p46_p6 = scmp.eq.s32.totalorder %s41_s25, 0 }
   0xa   : > { %p508_p8 = scmp.lt.s32.totalorder %s640_s20, 2  ;;  %s203_s28 = sand.u32 1, %s628_s17  }
   0xb   : > { %p711_p7 = por %p62_p5, %p61_p4  ;;  %s499_s29 = sshll.u32 %s636_s19, 3 }
   0xc   : > { %s717_s27 = scalar_select %p46_p6, %s628_s17, %s48_s23  }
   0xd   : > { %s488_s30 = sshll.u32 %s203_s28, 3  ;;  %s216_s7 = scalar_lea.hbm %s767_s0, %s499_s29 }
   0xe   : > { %s218_s8 = sshll.u32 %s216_s7, 4  ;;  %s207_s9 = scalar_lea.vmem [#allocation4], %s488_s30  ;;  %s219_s8 = int_to_ptr.hbm [resolvable:$true] %s218_s8 }
   0xf   : > { %s220_s10 = sshll.u32 %s207_s9, 4  ;;  %p505_p9 = pnand %p508_p8, %p704_p3  ;;  %s221_s10 = int_to_ptr.vmem [resolvable:$true] %s220_s10 }
  0x10   : > { %p491_p10 = scmp.ge.s32.totalorder %s640_s20, 1  ;;  %p225_p11 = scmp.lt.s32.totalorder %s640_s20, 3 }
  0x11   : > { %s204_s11 = scalar_lea.sflag [#allocation5], %s203_s28 }
  0x12   : > { %507 = dma.hbm_to_vmem [thread:$0]  (!%p505_p9), %s219_s8, 128, %s221_s10, %s204_s11  }
  0x13   : > { %p226_p12 = pnand %p491_p10, %p225_p11 }
  0x14   : > { %s231_s12 = sand.u32 (!%p226_p12), 1, %s624_s16  }
  0x15   : > { %229 = sbr.rel (%p226_p12) target bundleno = 207 (0xcf), region = 32  ;;  %s492_s13 = sshll.u32 (!%p226_p12), %s231_s12, 3 }
  0x16   : > { %s232_s14 = scalar_lea.sflag (!%p226_p12), [#allocation5], %s231_s12  ;;  %s235_s15 = scalar_lea.vmem (!%p226_p12), [#allocation4], %s492_s13 }
  0x1a   : > { %615 = dma.done.wait (%p711_p7), %s232_s14, 128  }
  0x1b   : > { %617 = vsyncadd (%p711_p7), %s232_s14, 4294967168  ;;  %p289_p13 = scmp.eq.s32.totalorder %s632_s18, 0  ;;  %p293_p0 = scmp.eq.s32.totalorder %s632_s18, 1 }
  0x1c   : > { %v642_v0 = vmov (%p289_p13), 0.0  }
  0x1d   : > { %297 = sbr.rel (!%p289_p13) target bundleno = 34 (0x22), region = 40  ;;  %298 = vst [vmem:[#allocation2] sm:$0xf] (%p289_p13), %v642_v0 }
  0x1e   : > { %299 = vst [vmem:[#allocation3] sm:$0xf] (%p289_p13), %v642_v0 }
  0x22 PF: > { %v302_v2 = vld [vmem:[%s235_s15] sm:$0xf]  ;;  %v306_v3 = vld [vmem:[%s235_s15 + $0x4] sm:$0xf]  ;;  %vm315_vm0 = vcmask (%p293_p0), 1043456   ;;  %vm341_vm4 = vcmask (%p293_p0), 3072  }
  0x23   : > { %v304_v6 = vmul.f32 %v302_v2, %v302_v2  ;;  %v308_v7 = vmul.f32 %v306_v3, %v306_v3  ;;  %v339_v28 = vld [vmem:[%s768_s1] sm:$0xf] (%p293_p0) }
  0x24   : > { %v300_v1 = vld [vmem:[#allocation2] sm:$0xf] }
  0x25   : > { %v303_v4 = vadd.f32 %v302_v2, %v300_v1  ;;  %v301_v5 = vld [vmem:[#allocation3] sm:$0xf]  ;;  %v343_v32 = vld [vmem:[%s769_s2] sm:$0xf] (%p293_p0) }
  0x26   : > { %v305_v9 = vadd.f32 %v304_v6, %v301_v5  ;;  %313 = sbr.rel (!%p293_p0) target bundleno = 207 (0xcf), region = 44 }
  0x27   : > { %v307_v8 = vadd.f32 %v306_v3, %v303_v4 }
  0x28   : > { %v309_v10 = vadd.f32 %v308_v7, %v305_v9 }
  0x29   : > { %310 = vst [vmem:[#allocation2] sm:$0xf] %v307_v8 }
  0x2a   : > { %311 = vst [vmem:[#allocation3] sm:$0xf] %v309_v10 }
  0x30   : > { %v314_v11 = vld [vmem:[#allocation2] sm:$0xf] }
  0x31   : > { %v316_v12 = vsel %vm315_vm0, %v314_v11, 0.0  ;;  %v319_v13 = vld [vmem:[#allocation3] sm:$0xf] }
  0x32   : > { %317 = vadd.xlane.f32.xlu0 %v316_v12  ;;  %v320_v14 = vsel %vm315_vm0, %v319_v13, 0.0 }
  0x3a   : > { %321 = vadd.xlane.f32.xlu0 %v320_v14 }
  0xa5   : > { %v318_v15 = vpop.xlane.xlu0 %317 }
  0xa6   : > { %v323_v16 = vmul.f32 0.001953125, %v318_v15 }
  0xa8   : > { %v325_v18 = vmul.f32 %v323_v16, %v323_v16 }
  0xad   : > { %v322_v17 = vpop.xlane.xlu0 %321 }
  0xae   : > { %v324_v19 = vmul.f32 0.001953125, %v322_v17 }
  0xb0   : > { %v326_v20 = vsub.f32 %v324_v19, %v325_v18 }
  0xb2   : > { %v327_v21 = vmax.f32 %v326_v20, 0.0 }
  0xb4   : > { %v328_v22 = vadd.f32 1e-05, %v327_v21 }
  0xb6   : > { %558 = vrsqrt.f32 %v328_v22  ;;  %vm335_vm2 = vweird.f32 %v328_v22 }
  0xbc   : > { %v559_v23 = vpop.eup %558 }
  0xbd   : > { %v330_v24 = vmul.f32 %v559_v23, %v328_v22  ;;  %vm336_vm1 = vweird.f32 %v559_v23 }
  0xbe   : > { %vm337_vm3 = vmor %vm335_vm2, %vm336_vm1 }
  0xbf   : > { %v331_v25 = vmul.f32 %v559_v23, %v330_v24 }
  0xc1   : > { %v332_v26 = vmul.f32 0.5, %v331_v25 }
  0xc3   : > { %v333_v27 = vsub.f32 1.5, %v332_v26 }
  0xc5   : > { %v334_v29 = vmul.f32 %v559_v23, %v333_v27 }
  0xc7   : > { %v338_v30 = vsel %vm337_vm3, %v559_v23, %v334_v29 }
  0xc8   : > { %v340_v31 = vmul.f32 %v339_v28, %v338_v30 }
  0xca   : > { %342 = vst.msk [vmem:[%s770_s3] sm:$0xf] %vm341_vm4, %v340_v31  ;;  %v344_v33 = vmul.f32 %v340_v31, %v323_v16 }
  0xcc   : > { %v345_v34 = vsub.f32 %v343_v32, %v344_v33 }
  0xce   : > { %346 = vst.msk [vmem:[%s771_s4] sm:$0xf] %vm341_vm4, %v345_v34 }
  0xcf PF: > { %s18_s20 = sadd.s32 1, %s640_s20   ;;  %s774_s15 = smov %s624_s16 }
  0xd0   : > { %p15_p1 = scmp.ge.s32.totalorder %s18_s20, 4   ;;  %s775_s16 = smov %s628_s17 }
  0xd1   : > { %s776_s17 = smov %s717_s27  ;;  %s777_s18 = smov %s636_s19 }
  0xd2   : > { %s778_s19 = smov %s780_s22  ;;  %17 = sbr.rel (!%p15_p1) target bundleno = 4 (0x4), region = 98 }
  0xd7   :  { %380 = vsyncpa [#allocation5], 1 }
  0xd8   :  { %382 = vsyncpa [#allocation5 + $0x1], 1 }

</bundles_post_ra>
